<compile_context>
chip_gen: v5e
topology: v5e:2x2
jax: 0.10.0
libtpu: 0.0.40
codegen_flags: <defaults>
</compile_context>

<pallas_src>
import jax
import jax.numpy as jnp
from jax import lax
from jax.experimental import pallas as pl
from jax.experimental.pallas import tpu as pltpu


def _pos_encoding_kernel(emb_ref, out_ref):
    """emb_ref: VMEM (tS, D) slice of the positional table.
    out_ref: VMEM (bB, tS, D) output block (bB batches folded per grid step).

    Single broadcasted block assignment -> wide unmasked vld/vst for D that is
    a multiple of 128; the leading batch-broadcast is just replicated stores.
    """
    out_ref[...] = jnp.broadcast_to(emb_ref[...][None, :, :], out_ref.shape)


# Leave headroom under v7x's 64 MiB physical VMEM (v5e/v6e have 128 MiB).
_V7X_SAFE_VMEM_BYTES = 48 << 20


def positional_encoding(inputs, emb_weight, *,
                        target_tile_bytes=4 << 20, max_batch_fold=4):
    """JAX wrapper reproducing PositionalEncoding.forward: (B, S) -> (B, S, D)."""
    B, S = inputs.shape
    max_pos, d_model = emb_weight.shape
    assert S <= max_pos, "seq_len must not exceed max_pos"

    dtype = emb_weight.dtype
    itemsize = jnp.dtype(dtype).itemsize

    if S % 8 == 0:
        # Common case: pass the full table; the BlockSpec only ever fetches the
        # first cdiv(S, tS) row-tiles, so no separate slice op / extra HBM pass.
        table = emb_weight
        rows_per_tile = max(8, (target_tile_bytes // (d_model * itemsize)) // 8 * 8)
        tS = min(S, rows_per_tile)
    else:
        # Ragged-S fallback: slice once so the block can legally equal the full
        # array dims ((8,128) rule).  Cheap for the small S this path implies.
        # TODO(synk): tile ragged S (cdiv + multiple-of-8 blocks) if S*D is huge.
        table = lax.slice(emb_weight, (0, 0), (S, d_model))
        tS = S

    tile_bytes = tS * d_model * itemsize

    # Fold a batch chunk into each grid step; shrink the fold if the
    # double-buffered in + out footprint would threaten v7x's 64 MiB VMEM.
    bB = max(1, min(B, max_batch_fold))
    while bB > 1 and 2 * (1 + bB) * tile_bytes > _V7X_SAFE_VMEM_BYTES:
        bB -= 1

    nS = pl.cdiv(S, tS)
    nB = pl.cdiv(B, bB)

    footprint = 2 * (1 + bB) * tile_bytes          # double-buffered in + out
    vmem_limit = max(32 << 20, footprint + (8 << 20))

    grid_spec = pltpu.PrefetchScalarGridSpec(
        num_scalar_prefetch=0,      # positions are arange(S): no gather needed
        # S-tiles outer, batch inner: the (tS, D) input block index is constant
        # across consecutive batch steps, so each table tile is DMA'd once per
        # S-tile instead of once per (s, b) grid point.
        grid=(nS, nB),
        in_specs=[
            pl.BlockSpec((tS, d_model), lambda s, b: (s, 0)),
        ],
        # (bB, tS, D): bB batches' worth of writeback per step.  For real
        # configs keep d_model a multiple of 128 so stores are unmasked
        # lane-dense vst (the toy D=32 demo uses masked stores).
        out_specs=pl.BlockSpec((bB, tS, d_model), lambda s, b: (b, s, 0)),
    )

    cost = pl.CostEstimate(
        flops=0,
        transcendentals=0,
        bytes_accessed=B * S * d_model * itemsize + S * d_model * itemsize,
    )

    # TODO(synk): two further wins left on the table: (a) replace the VMEM->VMEM
    # body copy with direct VMEM->HBM make_async_copy per batch (removes the
    # vst-slot copy and halves VMEM footprint); (b) fuse the broadcast into the
    # consumer (token_emb + pos_emb) so the B-fold (B,S,D) writeback is never
    # materialized at all.  Kept as-is to preserve the module's output.
    return pl.pallas_call(
        _pos_encoding_kernel,
        out_shape=jax.ShapeDtypeStruct((B, S, d_model), dtype),
        grid_spec=grid_spec,
        compiler_params=pltpu.CompilerParams(
            # Grid points are fully independent -> shard across TensorCores on
            # v7x megacore; measured-neutral on single-TC v5e/v6e.
            dimension_semantics=("parallel", "parallel"),
            vmem_limit_bytes=vmem_limit,
        ),
        cost_estimate=cost,
    )(table)


if __name__ == "__main__":
    # Small, deterministic example shapes.
    batch, seq_len = 2, 8
    max_pos, d_model = 16, 32

    key = jax.random.PRNGKey(0)
    k_inp, k_emb = jax.random.split(key)

    # Token ids — only their shape is used by the forward pass.
    inputs = jax.random.randint(k_inp, (batch, seq_len), 0, max_pos, dtype=jnp.int32)
    # nn.Embedding default init: N(0, 1).
    emb_weight = jax.random.normal(k_emb, (max_pos, d_model), dtype=jnp.float32)

    out = positional_encoding(inputs, emb_weight)
    out = jax.block_until_ready(out)

    # Pure-JAX reference: pos_embedding(arange(S)) broadcast over batch.
    ref = jnp.broadcast_to(emb_weight[jnp.arange(seq_len)], (batch, seq_len, d_model))
    assert out.shape == (batch, seq_len, d_model)
    assert out.dtype == jnp.float32
    assert jnp.array_equal(out, ref)

    print("KERNEL_OK")
</pallas_src>

<mosaic_0001>
module attributes {stable_mosaic.version = 11 : i64} {
  func.func @_pos_encoding_kernel(%arg0: i32, %arg1: i32, %arg2: memref<8x32xf32, #tpu.memory_space<vmem>>, %arg3: memref<2x8x32xf32, #tpu.memory_space<vmem>>) attributes {dimension_semantics = [#tpu.dimension_semantics<parallel>, #tpu.dimension_semantics<parallel>], iteration_bounds = array<i64: 1, 1>, scalar_prefetch = 0 : i64, scratch_operands = 0 : i64, tpu.core_type = #tpu.core_type<tc>, window_params = [{transform_indices = @transform_0, window_bounds = array<i64: 8, 32>}, {transform_indices = @transform_1, window_bounds = array<i64: 2, 8, 32>}]} {
    %c0 = arith.constant 0 : index
    %c0_0 = arith.constant 0 : index
    %0 = vector.load %arg2[%c0, %c0_0] : memref<8x32xf32, #tpu.memory_space<vmem>>, vector<8x32xf32>
    %1 = vector.shape_cast %0 : vector<8x32xf32> to vector<1x8x32xf32>
    %2 = vector.shape_cast %1 : vector<1x8x32xf32> to vector<1x8x32xf32>
    %3 = vector.broadcast %2 : vector<1x8x32xf32> to vector<2x8x32xf32>
    %c0_1 = arith.constant 0 : index
    %c0_2 = arith.constant 0 : index
    %c0_3 = arith.constant 0 : index
    %4 = vector.load %arg3[%c0_1, %c0_2, %c0_3] : memref<2x8x32xf32, #tpu.memory_space<vmem>>, vector<2x8x32xf32>
    tpu.vector_store %arg3[%c0_1, %c0_2, %c0_3], %3 {strides = array<i32>} : memref<2x8x32xf32, #tpu.memory_space<vmem>>, vector<2x8x32xf32>,
    return
  }
  func.func @transform_0(%arg0: i32, %arg1: i32) -> (i32, i32) {
    %c0_i32 = arith.constant 0 : i32
    %c0_i32_0 = arith.constant 0 : i32
    return %arg0, %c0_i32 : i32, i32
  }
  func.func @transform_1(%arg0: i32, %arg1: i32) -> (i32, i32, i32) {
    %c0_i32 = arith.constant 0 : i32
    %c0_i32_0 = arith.constant 0 : i32
    return %arg1, %arg0, %c0_i32 : i32, i32, i32
  }
}

</mosaic_0001>

<bundles_post_ra>
// kernel: tpu_custom_call.1
= control target key start
LH: loop header
LB: loop body
LE: loop exit
PB: predicated region body
PF: predicated region fallthrough
CT: control target
= control target key end

     0   :  { %6 = vsyncpa [#allocation3], 0  ;;  %s122_s0 = inlined_call_operand.hbm [shape: f32[16,32], index: 0, kind: input, shape index: {}]   ;;  %s123_s1 = inlined_call_operand.hbm [shape: f32[2,8,32], index: 1, kind: output, shape index: {}]  }
   0x1   :  { %7 = vsyncpa [#allocation4], 0  ;;  %s13_s8 = sshll.u32 %s122_s0, 4  ;;  %s102_s9 = smov [#allocation2]   ;;  %s14_s8 = int_to_ptr.hbm [resolvable:$true] %s13_s8 }
   0x2   :  { %s15_s10 = sshll.u32 %s102_s9, 4  ;;  %s16_s10 = int_to_ptr.vmem [resolvable:$true] %s15_s10 }
   0x3   :  { %18 = dma.hbm_to_vmem [thread:$0]  %s14_s8, 128, %s16_s10, [#allocation3]  }
   0x4   :  { %98 = dma.done.wait [#allocation3], 128  }
   0x5   :  { %99 = vsyncadd [#allocation3], 4294967168  ;;  %s103_s11 = smov [#allocation5]   ;;  %s33_s15 = sshll.u32 %s123_s1, 4  ;;  %vm24_vm0 = vcmask 261120   ;;  %v23_v0 = vld [vmem:[#allocation2] sm:$0xff]  ;;  %s34_s15 = int_to_ptr.hbm [resolvable:$true] %s33_s15 }
   0x6   :  { %s31_s12 = sshll.u32 %s103_s11, 4  ;;  %25 = vst.msk [vmem:[#allocation5] sm:$0xff] %vm24_vm0, %v23_v0  ;;  %s104_s0 = smov 128   ;;  %s32_s12 = int_to_ptr.vmem [resolvable:$true] %s31_s12 }
   0x7   :  { %26 = vst.msk [vmem:[#allocation5 + $0x8] sm:$0xff] %vm24_vm0, %v23_v0  ;;  %s105_s16 = smov 8  }
   0x8   :  { %39 = dma.vmem_to_hbm [thread:$0]  %s32_s12, 256, %s34_s15, [#allocation4], %s104_s0, %s104_s0, %s105_s16  }
   0x9   :  { %100 = dma.done.wait [#allocation4], 256  }
   0xa   :  { %101 = vsyncadd [#allocation4], 4294967040 }
   0xb   :  { %44 = vsyncpa [#allocation3], 1 }
   0xc   :  { %45 = vsyncpa [#allocation4], 1 }

</bundles_post_ra>
